<compile_context>
chip_gen: v5e
topology: v5e:2x2
jax: 0.10.0
libtpu: 0.0.40
codegen_flags: <defaults>
</compile_context>

<pallas_src>
import functools

import jax
import jax.numpy as jnp
from jax.experimental import pallas as pl
from jax.experimental.pallas import tpu as pltpu


def _ce_label_smooth_kernel(logits_ref, tgt_ref, out_ref, *,
                            epsilon, num_classes, batch, tile_n,
                            tiles_per_core):
    # logits_ref: (tile_n, C) native dtype; tgt_ref: (tile_n, 1) i32;
    # out_ref: (1, 1) f32 per-core partial sum (resident across inner axis).
    p = pl.program_id(0)          # core / parallel axis
    i = pl.program_id(1)          # sequential tile axis (accumulator carried)
    global_tile = p * tiles_per_core + i

    @pl.when(i == 0)
    def _init():
        out_ref[...] = jnp.zeros_like(out_ref)

    xf = logits_ref[...].astype(jnp.float32)                 # (tile_n, C)
    tgt = tgt_ref[...]                                       # (tile_n, 1) i32

    # Numerically stable logsumexp along the class (lane) axis.
    m = jnp.max(xf, axis=1, keepdims=True)                   # (tile_n, 1)
    lse = m + jnp.log(jnp.sum(jnp.exp(xf - m), axis=1, keepdims=True))

    # One weighted lane reduce: sum_j smoothed_j * x_j,
    #   smoothed_j = eps/C + (1-eps) * [j == target].
    base = epsilon / num_classes
    class_ids = jax.lax.broadcasted_iota(jnp.int32, (1, xf.shape[1]), 1)
    w = jnp.where(class_ids == tgt, 1.0 - epsilon + base, base)  # (tile_n, C)
    weighted = jnp.sum(w * xf, axis=1, keepdims=True)            # (tile_n, 1)

    per_row = lse - weighted                                     # (tile_n, 1)

    # Mask rows past the true batch (partial last tile / clamped overflow tile).
    row_ids = (global_tile * tile_n
               + jax.lax.broadcasted_iota(jnp.int32, per_row.shape, 0))
    per_row = jnp.where(row_ids < batch, per_row, 0.0)

    out_ref[...] = out_ref[...] + jnp.sum(per_row)


def _vmem_limit_bytes():
    """Scoped-VMEM limit derived from the actual chip (64 MiB on v7x,
    128 MiB on v5e/v6e), with headroom for Mosaic internal scratch."""
    try:
        cap = int(pltpu.get_tpu_info().vmem_capacity_bytes)
    except Exception:
        cap = 64 * 1024 * 1024  # conservative v7x-sized fallback
    return min((cap * 3) // 4, 96 * 1024 * 1024)


def _choose_tile_n(n, c, itemsize, tile_budget_bytes):
    """Batch tile sized by actual VMEM footprint (not just the raw block):
       2x double-buffered input block rows (native dtype)
     + ~3 live full-width f32 temporaries
     + targets block, lane-padded to 128 i32 lanes, double-buffered."""
    bytes_per_row = 2 * c * itemsize + 3 * c * 4 + 2 * 128 * 4
    tn = tile_budget_bytes // max(1, bytes_per_row)
    tn = max(8, (int(tn) // 8) * 8)
    n_up = max(8, ((n + 7) // 8) * 8)   # never larger than the (8-rounded) batch
    return min(tn, n_up)


def cross_entropy_label_smooth(logits, targets, *, num_classes, epsilon,
                               tile_n=None):
    """Pallas-backed CrossEntropyLabelSmooth forward. Returns a scalar f32.

    `logits` may be f32 or bf16 (kept in native dtype on the HBM->VMEM path).
    """
    n, c = logits.shape
    assert c == num_classes
    itemsize = jnp.dtype(logits.dtype).itemsize

    vmem_limit = _vmem_limit_bytes()
    if tile_n is None:
        tile_n = _choose_tile_n(n, c, itemsize, vmem_limit // 2)
    assert tile_n % 8 == 0

    n_tiles = pl.cdiv(n, tile_n)
    num_par = 2 if n_tiles >= 2 else 1          # both TensorCores on v7x
    tpc = pl.cdiv(n_tiles, num_par)             # tiles per core (inner extent)

    tgt2d = targets.astype(jnp.int32).reshape(n, 1)

    kernel = functools.partial(
        _ce_label_smooth_kernel,
        epsilon=float(epsilon),
        num_classes=int(num_classes),
        batch=int(n),
        tile_n=int(tile_n),
        tiles_per_core=int(tpc),
    )

    def _in_map(p, i):
        # Clamp ragged overflow tiles onto the last valid block; the in-kernel
        # row mask (based on the *unclamped* global tile index) zeroes them.
        return (jnp.minimum(p * tpc + i, n_tiles - 1), 0)

    cost = pl.CostEstimate(
        flops=int(8 * n * c),
        transcendentals=int(n * c),
        bytes_accessed=int(n * c * itemsize + n * 4 + num_par * 4),
    )

    partials = pl.pallas_call(
        kernel,
        out_shape=jax.ShapeDtypeStruct((num_par, 1), jnp.float32),
        grid_spec=pltpu.PrefetchScalarGridSpec(
            num_scalar_prefetch=0,
            grid=(num_par, tpc),
            in_specs=[
                pl.BlockSpec((tile_n, c), _in_map),    # logits tile
                pl.BlockSpec((tile_n, 1), _in_map),    # targets tile
            ],
            out_specs=pl.BlockSpec((1, 1), lambda p, i: (p, 0)),
        ),
        compiler_params=pltpu.CompilerParams(
            dimension_semantics=("parallel", "arbitrary"),
            vmem_limit_bytes=int(vmem_limit),
        ),
        cost_estimate=cost,
    )(logits, tgt2d)

    return jnp.sum(partials) * (1.0 / n)


def _reference(logits, targets, *, num_classes, epsilon):
    log_probs = jax.nn.log_softmax(logits.astype(jnp.float32), axis=1)
    one_hot = jax.nn.one_hot(targets, num_classes, dtype=jnp.float32)
    smoothed = (1.0 - epsilon) * one_hot + epsilon / num_classes
    return (-smoothed * log_probs).mean(0).sum()


if __name__ == "__main__":
    # --- primary test: small shapes consistent with the module ---
    num_classes = 16
    epsilon = 0.1
    batch = 8

    key = jax.random.PRNGKey(0)
    k_logits, k_targets, k2, k3 = jax.random.split(key, 4)
    logits = jax.random.normal(k_logits, (batch, num_classes), dtype=jnp.float32)
    targets = jax.random.randint(k_targets, (batch,), 0, num_classes, dtype=jnp.int32)

    loss = cross_entropy_label_smooth(
        logits, targets, num_classes=num_classes, epsilon=epsilon
    )
    loss = jax.block_until_ready(loss)
    ref = _reference(logits, targets, num_classes=num_classes, epsilon=epsilon)
    assert jnp.allclose(loss, ref, atol=1e-5, rtol=1e-5), (loss, ref)

    # --- secondary test: bf16 logits, multi-tile grid split over the parallel
    #     axis, un-padded partial last tile ---
    nc2, n2 = 256, 200
    logits2 = jax.random.normal(k2, (n2, nc2), dtype=jnp.float32).astype(jnp.bfloat16)
    targets2 = jax.random.randint(k3, (n2,), 0, nc2, dtype=jnp.int32)
    loss2 = cross_entropy_label_smooth(
        logits2, targets2, num_classes=nc2, epsilon=epsilon, tile_n=64
    )
    loss2 = jax.block_until_ready(loss2)
    ref2 = _reference(logits2, targets2, num_classes=nc2, epsilon=epsilon)
    assert jnp.allclose(loss2, ref2, atol=2e-3, rtol=2e-3), (loss2, ref2)

    print("KERNEL_OK")
</pallas_src>

<mosaic_0001>
module attributes {stable_mosaic.version = 11 : i64} {
  func.func @_ce_label_smooth_kernel(%arg0: i32, %arg1: i32, %arg2: memref<8x16xf32, #tpu.memory_space<vmem>>, %arg3: memref<8x1xi32, #tpu.memory_space<vmem>>, %arg4: memref<1x1xf32, #tpu.memory_space<vmem>>) attributes {dimension_semantics = [#tpu.dimension_semantics<parallel>, #tpu.dimension_semantics<arbitrary>], iteration_bounds = array<i64: 1, 1>, scalar_prefetch = 0 : i64, scratch_operands = 0 : i64, tpu.core_type = #tpu.core_type<tc>, window_params = [{transform_indices = @transform_0, window_bounds = array<i64: 8, 16>}, {transform_indices = @transform_1, window_bounds = array<i64: 8, 1>}, {transform_indices = @transform_2, window_bounds = array<i64: 1, 1>}]} {
    %c1_i32 = arith.constant 1 : i32
    %0 = arith.muli %arg0, %c1_i32 : i32
    %1 = arith.addi %0, %arg1 : i32
    %c0_i32 = arith.constant 0 : i32
    %2 = arith.cmpi eq, %arg1, %c0_i32 : i32
    %3 = arith.extui %2 : i1 to i32
    %c0_i32_0 = arith.constant 0 : i32
    %4 = arith.cmpi ne, %3, %c0_i32_0 : i32
    scf.if %4 {
      %cst_15 = arith.constant 0.000000e+00 : f32
      %43 = vector.broadcast %cst_15 : f32 to vector<1x1xf32>
      %c0_16 = arith.constant 0 : index
      %c0_17 = arith.constant 0 : index
      %44 = vector.load %arg4[%c0_16, %c0_17] : memref<1x1xf32, #tpu.memory_space<vmem>>, vector<1x1xf32>
      tpu.vector_store %arg4[%c0_16, %c0_17], %43 {strides = array<i32>} : memref<1x1xf32, #tpu.memory_space<vmem>>, vector<1x1xf32>,
    } else {
    }
    %c0 = arith.constant 0 : index
    %c0_1 = arith.constant 0 : index
    %5 = vector.load %arg2[%c0, %c0_1] : memref<8x16xf32, #tpu.memory_space<vmem>>, vector<8x16xf32>
    %c0_2 = arith.constant 0 : index
    %c0_3 = arith.constant 0 : index
    %6 = vector.load %arg3[%c0_2, %c0_3] : memref<8x1xi32, #tpu.memory_space<vmem>>, vector<8x1xi32>
    %cst = arith.constant dense<0xFF800000> : vector<8xf32>
    %7 = vector.multi_reduction <maximumf>, %5, %cst [1] : vector<8x16xf32> to vector<8xf32>
    %8 = vector.shape_cast %7 : vector<8xf32> to vector<8x1xf32>
    %9 = vector.broadcast %8 : vector<8x1xf32> to vector<8x16xf32>
    %10 = arith.subf %5, %9 : vector<8x16xf32>
    %11 = math.exp %10 : vector<8x16xf32>
    %cst_4 = arith.constant dense<0.000000e+00> : vector<8xf32>
    %12 = vector.multi_reduction <add>, %11, %cst_4 [1] : vector<8x16xf32> to vector<8xf32>
    %13 = vector.shape_cast %12 : vector<8xf32> to vector<8x1xf32>
    %14 = math.log %13 : vector<8x1xf32>
    %15 = arith.addf %8, %14 : vector<8x1xf32>
    %16 = tpu.iota {dimensions = array<i32: 1>} : vector<1x16xi32>
    %17 = vector.broadcast %16 : vector<1x16xi32> to vector<8x16xi32>
    %18 = vector.broadcast %6 : vector<8x1xi32> to vector<8x16xi32>
    %19 = arith.cmpi eq, %17, %18 : vector<8x16xi32>
    %cst_5 = arith.constant 9.062500e-01 : f32
    %cst_6 = arith.constant 6.250000e-03 : f32
    %20 = vector.broadcast %cst_5 : f32 to vector<8x16xf32>
    %21 = vector.broadcast %cst_6 : f32 to vector<8x16xf32>
    %22 = arith.select %19, %20, %21 : vector<8x16xi1>, vector<8x16xf32>
    %23 = arith.mulf %22, %5 : vector<8x16xf32>
    %cst_7 = arith.constant dense<0.000000e+00> : vector<8xf32>
    %24 = vector.multi_reduction <add>, %23, %cst_7 [1] : vector<8x16xf32> to vector<8xf32>
    %25 = vector.shape_cast %24 : vector<8xf32> to vector<8x1xf32>
    %26 = arith.subf %15, %25 : vector<8x1xf32>
    %c8_i32 = arith.constant 8 : i32
    %27 = arith.muli %1, %c8_i32 : i32
    %28 = tpu.iota {dimensions = array<i32: 0>} : vector<8x1xi32>
    %29 = vector.broadcast %27 : i32 to vector<8x1xi32>
    %30 = arith.addi %29, %28 : vector<8x1xi32>
    %c8_i32_8 = arith.constant 8 : i32
    %31 = vector.broadcast %c8_i32_8 : i32 to vector<8x1xi32>
    %32 = arith.cmpi slt, %30, %31 : vector<8x1xi32>
    %cst_9 = arith.constant 0.000000e+00 : f32
    %33 = vector.broadcast %cst_9 : f32 to vector<8x1xf32>
    %34 = arith.select %32, %26, %33 : vector<8x1xi1>, vector<8x1xf32>
    %c0_10 = arith.constant 0 : index
    %c0_11 = arith.constant 0 : index
    %35 = vector.load %arg4[%c0_10, %c0_11] : memref<1x1xf32, #tpu.memory_space<vmem>>, vector<1x1xf32>
    %36 = vector.shape_cast %34 : vector<8x1xf32> to vector<1x8x1xf32>
    %cst_12 = arith.constant dense<0.000000e+00> : vector<1xf32>
    %37 = vector.multi_reduction <add>, %36, %cst_12 [1, 2] : vector<1x8x1xf32> to vector<1xf32>
    %38 = vector.shape_cast %37 : vector<1xf32> to vector<1x1x1xf32>
    %39 = vector.extract %38[0, 0, 0] : f32 from vector<1x1x1xf32>
    %40 = vector.broadcast %39 : f32 to vector<1x1xf32>
    %41 = arith.addf %35, %40 : vector<1x1xf32>
    %c0_13 = arith.constant 0 : index
    %c0_14 = arith.constant 0 : index
    %42 = vector.load %arg4[%c0_13, %c0_14] : memref<1x1xf32, #tpu.memory_space<vmem>>, vector<1x1xf32>
    tpu.vector_store %arg4[%c0_13, %c0_14], %41 {strides = array<i32>} : memref<1x1xf32, #tpu.memory_space<vmem>>, vector<1x1xf32>,
    return
  }
  func.func @transform_0(%arg0: i32, %arg1: i32) -> (i32, i32) {
    %c1_i32 = arith.constant 1 : i32
    %0 = arith.muli %arg0, %c1_i32 : i32
    %1 = arith.addi %0, %arg1 : i32
    %c0_i32 = arith.constant 0 : i32
    %2 = arith.minsi %1, %c0_i32 : i32
    %c0_i32_0 = arith.constant 0 : i32
    %c0_i32_1 = arith.constant 0 : i32
    return %2, %c0_i32_0 : i32, i32
  }
  func.func @transform_1(%arg0: i32, %arg1: i32) -> (i32, i32) {
    %c1_i32 = arith.constant 1 : i32
    %0 = arith.muli %arg0, %c1_i32 : i32
    %1 = arith.addi %0, %arg1 : i32
    %c0_i32 = arith.constant 0 : i32
    %2 = arith.minsi %1, %c0_i32 : i32
    %c0_i32_0 = arith.constant 0 : i32
    %c0_i32_1 = arith.constant 0 : i32
    return %2, %c0_i32_0 : i32, i32
  }
  func.func @transform_2(%arg0: i32, %arg1: i32) -> (i32, i32) {
    %c0_i32 = arith.constant 0 : i32
    %c0_i32_0 = arith.constant 0 : i32
    return %arg0, %c0_i32 : i32, i32
  }
}

</mosaic_0001>

<bundles_post_ra>
// kernel: tpu_custom_call.1
= control target key start
LH: loop header
LB: loop body
LE: loop exit
PB: predicated region body
PF: predicated region fallthrough
CT: control target
= control target key end

     0   :  { %vm75_vm0 = vcmask 130048   ;;  %s221_s0 = inlined_call_operand.vmem [shape: f32[8,16], index: 0, kind: input, shape index: {}]   ;;  %s222_s1 = inlined_call_operand.vmem [shape: s32[8,1], index: 1, kind: input, shape index: {}]   ;;  %s223_s2 = inlined_call_operand.hbm [shape: f32[1,1], index: 2, kind: output, shape index: {}]  }
   0x1   :  { %v73_v0 = vld [vmem:[%s221_s0] sm:$0xff] }
   0x2   :  { %7 = vsyncpa [#allocation3], 0  ;;  %v76_v1 = vsel %vm75_vm0, %v73_v0, -inf  ;;  %v188_v2 = vmov 0   ;;  %v74_v3 = vld [vmem:[%s222_s1] sm:$0xff]  ;;  %v88_v9 = vlaneseq  ;;  %vm108_vm2 = vcmask 7168  }
   0x3   :  { %157 = vset.pattern.permute.xlu0 %v188_v2  ;;  %v189_v12 = vmov 0.00625   ;;  %vm71_vm3 = vcmask 0   ;;  %v190_v23 = vmov 0.0   ;;  %s191_s0 = smov [#allocation2]   ;;  %s130_s15 = sshll.u32 %s223_s2, 4  ;;  %s131_s15 = int_to_ptr.hbm [resolvable:$true] %s130_s15 }
   0x4   :  { %77 = vmax.xlane.f32.xlu0 %v76_v1  ;;  %v89_v10 = vand.u32 127, %v88_v9  ;;  %72 = vst.msk [vmem:[#allocation2] sm:$0x1] %vm71_vm3, %v190_v23  ;;  %s128_s1 = sshll.u32 %s191_s0, 4  ;;  %s129_s1 = int_to_ptr.vmem [resolvable:$true] %s128_s1 }
   0xb   :  { %v107_v31 = vld [vmem:[#allocation2] sm:$0x1] }
  0x18   :  { %91 = vperm.xlu0 %157, %v74_v3  }
  0x77   :  { %v78_v4 = vpop.xlane.xlu0 %77 }
  0x78   :  { %v79_v5 = vsub.f32 %v73_v0, %v78_v4 }
  0x7a   :  { %v80_v6 = vmul.f32 1.442695, %v79_v5 }
  0x7c   :  { %158 = vpow2.f32 %v80_v6 }
  0x82   :  { %v159_v7 = vpop.eup %158 }
  0x83   :  { %v82_v8 = vsel %vm75_vm0, %v159_v7, 0.0 }
  0x84   :  { %83 = vadd.xlane.f32.xlu1 %v82_v8 }
  0x8a   :  { %v92_v11 = vpop.permute.xlu0 %91 }
  0x8b   :  { %vm93_vm1 = vcmp.eq.s32.totalorder %v89_v10, %v92_v11 }
  0x8c   :  { %v94_v13 = vsel %vm93_vm1, 0.90625, %v189_v12 }
  0x8d   :  { %v95_v14 = vmul.f32 %v94_v13, %v73_v0 }
  0x8f   :  { %v96_v15 = vsel %vm75_vm0, %v95_v14, 0.0 }
  0x90   :  { %97 = vadd.xlane.f32.xlu1 %v96_v15 }
  0xf7   :  { %v84_v16 = vpop.xlane.xlu1 %83 }
  0xf8   :  { %160 = vlog2.f32 %v84_v16 }
  0xfe   :  { %v161_v17 = vpop.eup %160 }
  0xff   :  { %v86_v18 = vmul.f32 0.6931472, %v161_v17 }
 0x101   :  { %v87_v19 = vadd.f32 %v86_v18, %v78_v4 }
 0x103   :  { %v98_v20 = vpop.xlane.xlu1 %97 }
 0x104   :  { %v99_v21 = vsub.f32 %v87_v19, %v98_v20 }
 0x106   :  { %v109_v22 = vsel %vm108_vm2, %v99_v21, 0.0 }
 0x107   :  { %110 = vadd.xlane.f32.xlu2 %v109_v22 }
 0x17a   :  { %v111_v24 = vpop.xlane.xlu2 %110 }
 0x17b   :  { %v112_v25 = vrot.slane %v111_v24, 4 }
 0x17d   :  { %v113_v26 = vadd.f32 %v112_v25, %v111_v24 }
 0x17f   :  { %v114_v27 = vrot.slane %v113_v26, 2 }
 0x181   :  { %v115_v28 = vadd.f32 %v114_v27, %v113_v26 }
 0x183   :  { %v116_v29 = vrot.slane %v115_v28, 1 }
 0x185   :  { %v117_v30 = vadd.f32 %v116_v29, %v115_v28 }
 0x187   :  { %151 = vpush %v117_v30 }
 0x1b8   :  { %s152_s16 = spop %151 }
 0x1b9   :  { %v119_v32 = vstv %s152_s16 }
 0x1ba   :  { %v120_v33 = vadd.f32 %v119_v32, %v107_v31 }
 0x1bc   :  { %122 = vst.msk [vmem:[#allocation2] sm:$0x1] %vm71_vm3, %v120_v33 }
 0x1bd   :  { %133 = dma.vmem_to_hbm [thread:$0]  %s129_s1, 16, %s131_s15, [#allocation3]  }
 0x1be   :  { %186 = dma.done.wait [#allocation3], 16  }
 0x1bf   :  { %187 = vsyncadd [#allocation3], 4294967280 }
 0x1c0   :  { %138 = vsyncpa [#allocation3], 1 }

</bundles_post_ra>
